<compile_context>
chip_gen: v7x
topology: tpu7x:2x2x1
jax: 0.10.0
libtpu: 0.0.40
codegen_flags: <defaults>
</compile_context>

<pallas_src>
import jax
import jax.numpy as jnp
from jax import lax
from jax.experimental import pallas as pl
from jax.experimental.pallas import tpu as pltpu

LANE = 128
_TARGET_STEP_BYTES = 8 << 20   # combined HBM traffic (both inputs) per grid step


def _sublane(dtype) -> int:
    """Sublane packing granularity for a dtype (8 for f32, 16 for bf16, 32 for i8)."""
    itemsize = jnp.dtype(dtype).itemsize
    return max(8, 8 * (4 // max(1, itemsize)))


def _make_mse_kernel(tm: int, rows: int, total_blocks: int,
                     tiles_per_core: int, num_cores: int):
    """Kernel: per-core (8, 128) partial sum of squared differences."""
    rows_in_last = rows - (total_blocks - 1) * tm     # static
    last_is_ragged = rows_in_last != tm               # static
    has_dups = (num_cores * tiles_per_core) != total_blocks  # static

    def kernel(p_ref, t_ref, o_ref, acc_ref):
        i = pl.program_id(1)   # inner, sequential reduction axis

        @pl.when(i == 0)
        def _():
            acc_ref[...] = jnp.zeros_like(acc_ref)

        def accumulate(masked: bool):
            # Widen in-register; inputs are DMA'd in their native dtype.
            d = p_ref[...].astype(jnp.float32) - t_ref[...].astype(jnp.float32)
            if masked:
                # Only the ragged last block pays for this (gated by pl.when
                # below). Mask before squaring so garbage/NaN padding rows in
                # the Pallas edge block cannot leak.
                r = lax.broadcasted_iota(jnp.int32, (tm, LANE), 0)
                d = jnp.where(r < rows_in_last, d, jnp.float32(0.0))
            sq = d * d
            # Pure VPU vreg adds into an (8,128) accumulator; the expensive
            # cross-lane/sublane collapse happens once, in the wrapper.
            acc_ref[...] += jnp.sum(sq.reshape(tm // 8, 8, LANE), axis=0)

        if not last_is_ragged and not has_dups:
            # Common case: every block is full and owned by exactly one core.
            accumulate(False)
        else:
            block = pl.program_id(0) * tiles_per_core + i
            last = total_blocks - 1

            @pl.when(block < last)
            def _():
                accumulate(False)

            @pl.when(block == last)
            def _():
                accumulate(last_is_ragged)
            # block > last: clamped duplicate block read by an over-provisioned
            # core (num_cores > 1 only) -> contributes nothing, skipped entirely.

        @pl.when(i == pl.num_programs(1) - 1)
        def _():
            o_ref[0] = acc_ref[...]

    return kernel


def mse_loss(predicted: jax.Array, target: jax.Array, *,
             target_step_bytes: int = _TARGET_STEP_BYTES,
             num_cores: int = 1) -> jax.Array:
    """Mean squared error via a Pallas TPU streaming reduction kernel.

    num_cores=1 is correct for single-TensorCore chips (v5e/v6e). On v7x pass
    num_cores=2 for an explicit cross-TensorCore split (CORE_PARALLEL axis).
    """
    assert predicted.shape == target.shape, "shape mismatch"
    n = predicted.size
    assert n > 0, "empty input"

    p = predicted.reshape(-1)
    t = target.reshape(-1)

    p_bytes = jnp.dtype(p.dtype).itemsize
    t_bytes = jnp.dtype(t.dtype).itemsize
    sub = max(_sublane(p.dtype), _sublane(t.dtype))
    chunk = sub * LANE

    # Aligned main body (zero-copy reshape, no O(n) jnp.pad copy) + tiny tail
    # (< sub*128 elements) folded in with plain jnp in the wrapper.
    n_main = (n // chunk) * chunk
    tail = n - n_main

    def _tail_sq_sum():
        dp = p[n_main:].astype(jnp.float32) - t[n_main:].astype(jnp.float32)
        return jnp.sum(dp * dp)

    if n_main == 0:
        # Smaller than one aligned chunk: no kernel launch needed.
        return _tail_sq_sum() / n

    rows = n_main // LANE                       # multiple of `sub` (>= 8)
    p2 = (p if n_main == n else p[:n_main]).reshape(rows, LANE)
    t2 = (t if n_main == n else t[:n_main]).reshape(rows, LANE)

    # Tile size chosen by bytes/step so narrow dtypes still move
    # ~target_step_bytes of HBM traffic per grid step (f32: tm=8192 rows).
    bytes_per_row = LANE * (p_bytes + t_bytes)
    tm = max(sub, (target_step_bytes // bytes_per_row) // sub * sub)
    tm_eff = min(tm, rows)                      # rows is a multiple of sub too

    num_cores = max(1, int(num_cores))
    total_blocks = pl.cdiv(rows, tm_eff)
    tiles_per_core = pl.cdiv(total_blocks, num_cores)
    has_dups = num_cores * tiles_per_core != total_blocks

    if has_dups:
        # Clamp so the DMA never targets a block past the array; clamped
        # duplicates are skipped inside the kernel.
        def in_map(c, i):
            return (jnp.minimum(c * tiles_per_core + i, total_blocks - 1), 0)
    else:
        def in_map(c, i):
            return (c * tiles_per_core + i, 0)

    # Double-buffered inputs + headroom: above v5e's 16 MiB default scoped
    # VMEM, comfortably under v7x's 64 MiB physical VMEM.
    block_in_bytes = tm_eff * LANE * (p_bytes + t_bytes)
    vmem_limit = int(min(40 << 20, max(16 << 20, 2 * block_in_bytes + (8 << 20))))

    if num_cores > 1:
        # Explicit cross-TensorCore sharding (v7x); plain "parallel" does not
        # reliably shard across TCs.
        core_sem = getattr(pltpu, "CORE_PARALLEL", "parallel")
    else:
        core_sem = "arbitrary"

    kernel = _make_mse_kernel(tm_eff, rows, total_blocks, tiles_per_core, num_cores)

    # TODO(synk): optionally sweep pipeline_mode=pl.Buffered(3) on the input
    # BlockSpecs on v7x once tm is finalized (expected <= few % gain).
    partials = pl.pallas_call(
        kernel,
        out_shape=jax.ShapeDtypeStruct((num_cores, 8, LANE), jnp.float32),
        grid_spec=pltpu.PrefetchScalarGridSpec(
            num_scalar_prefetch=0,
            grid=(num_cores, tiles_per_core),
            in_specs=[
                pl.BlockSpec((tm_eff, LANE), in_map),
                pl.BlockSpec((tm_eff, LANE), in_map),
            ],
            out_specs=pl.BlockSpec((1, 8, LANE), lambda c, i: (c, 0, 0)),
            scratch_shapes=[pltpu.VMEM((8, LANE), jnp.float32)],
        ),
        compiler_params=pltpu.CompilerParams(
            dimension_semantics=(core_sem, "arbitrary"),
            vmem_limit_bytes=vmem_limit,
        ),
    )(p2, t2)

    total = jnp.sum(partials)
    if tail:
        total = total + _tail_sq_sum()
    return total / n


if __name__ == "__main__":
    key = jax.random.PRNGKey(0)
    k1, k2, k3, k4 = jax.random.split(key, 4)

    # Image-like prediction task: batch=2, channels=4, spatial=16x16.
    predicted = jax.random.normal(k1, (2, 4, 16, 16), dtype=jnp.float32)
    target = jax.random.normal(k2, (2, 4, 16, 16), dtype=jnp.float32)

    loss = mse_loss(predicted, target)
    jax.block_until_ready(loss)
    ref = jnp.mean((predicted - target) ** 2)
    assert jnp.allclose(loss, ref, rtol=1e-5, atol=1e-6), (loss, ref)

    # Ragged element count exercises the aligned-prefix + wrapper-tail path.
    p_odd = jax.random.normal(k3, (3, 5, 7, 11), dtype=jnp.float32)
    t_odd = jax.random.normal(k4, (3, 5, 7, 11), dtype=jnp.float32)
    loss_odd = mse_loss(p_odd, t_odd)
    jax.block_until_ready(loss_odd)
    ref_odd = jnp.mean((p_odd - t_odd) ** 2)
    assert jnp.allclose(loss_odd, ref_odd, rtol=1e-5, atol=1e-6), (loss_odd, ref_odd)

    print("KERNEL_OK")
</pallas_src>

<mosaic_0001>
module attributes {stable_mosaic.version = 11 : i64} {
  func.func @kernel(%arg0: i32, %arg1: i32, %arg2: memref<16x128xf32, #tpu.memory_space<vmem>>, %arg3: memref<16x128xf32, #tpu.memory_space<vmem>>, %arg4: memref<1x8x128xf32, #tpu.memory_space<vmem>>, %arg5: memref<8x128xf32, #tpu.memory_space<vmem>>) attributes {dimension_semantics = [#tpu.dimension_semantics<arbitrary>, #tpu.dimension_semantics<arbitrary>], iteration_bounds = array<i64: 1, 1>, scalar_prefetch = 0 : i64, scratch_operands = 1 : i64, tpu.core_type = #tpu.core_type<tc>, window_params = [{transform_indices = @transform_0, window_bounds = array<i64: 16, 128>}, {transform_indices = @transform_1, window_bounds = array<i64: 16, 128>}, {transform_indices = @transform_2, window_bounds = array<i64: 1, 8, 128>}]} {
    %c0_i32 = arith.constant 0 : i32
    %0 = arith.cmpi eq, %arg1, %c0_i32 : i32
    %1 = arith.extui %0 : i1 to i32
    %c0_i32_0 = arith.constant 0 : i32
    %2 = arith.cmpi ne, %1, %c0_i32_0 : i32
    scf.if %2 {
      %cst_10 = arith.constant 0.000000e+00 : f32
      %15 = vector.broadcast %cst_10 : f32 to vector<8x128xf32>
      %c0_11 = arith.constant 0 : index
      %c0_12 = arith.constant 0 : index
      %16 = vector.load %arg5[%c0_11, %c0_12] : memref<8x128xf32, #tpu.memory_space<vmem>>, vector<8x128xf32>
      tpu.vector_store %arg5[%c0_11, %c0_12], %15 {strides = array<i32>} : memref<8x128xf32, #tpu.memory_space<vmem>>, vector<8x128xf32>,
    } else {
    }
    %c0 = arith.constant 0 : index
    %c0_1 = arith.constant 0 : index
    %3 = vector.load %arg2[%c0, %c0_1] : memref<16x128xf32, #tpu.memory_space<vmem>>, vector<16x128xf32>
    %c0_2 = arith.constant 0 : index
    %c0_3 = arith.constant 0 : index
    %4 = vector.load %arg3[%c0_2, %c0_3] : memref<16x128xf32, #tpu.memory_space<vmem>>, vector<16x128xf32>
    %5 = arith.subf %3, %4 : vector<16x128xf32>
    %6 = arith.mulf %5, %5 : vector<16x128xf32>
    %c0_4 = arith.constant 0 : index
    %c0_5 = arith.constant 0 : index
    %7 = vector.load %arg5[%c0_4, %c0_5] : memref<8x128xf32, #tpu.memory_space<vmem>>, vector<8x128xf32>
    %8 = vector.shape_cast %6 : vector<16x128xf32> to vector<2x8x128xf32>
    %cst = arith.constant dense<0.000000e+00> : vector<8x128xf32>
    %9 = vector.multi_reduction <add>, %8, %cst [0] : vector<2x8x128xf32> to vector<8x128xf32>
    %10 = arith.addf %7, %9 : vector<8x128xf32>
    %c0_6 = arith.constant 0 : index
    %c0_7 = arith.constant 0 : index
    %11 = vector.load %arg5[%c0_6, %c0_7] : memref<8x128xf32, #tpu.memory_space<vmem>>, vector<8x128xf32>
    tpu.vector_store %arg5[%c0_6, %c0_7], %10 {strides = array<i32>} : memref<8x128xf32, #tpu.memory_space<vmem>>, vector<8x128xf32>,
    %c0_i32_8 = arith.constant 0 : i32
    %12 = arith.cmpi eq, %arg1, %c0_i32_8 : i32
    %13 = arith.extui %12 : i1 to i32
    %c0_i32_9 = arith.constant 0 : i32
    %14 = arith.cmpi ne, %13, %c0_i32_9 : i32
    scf.if %14 {
      %c0_10 = arith.constant 0 : index
      %c0_11 = arith.constant 0 : index
      %15 = vector.load %arg5[%c0_10, %c0_11] : memref<8x128xf32, #tpu.memory_space<vmem>>, vector<8x128xf32>
      %c0_12 = arith.constant 0 : index
      %c0_13 = arith.constant 0 : index
      %c0_14 = arith.constant 0 : index
      %16 = vector.load %arg4[%c0_12, %c0_13, %c0_14] : memref<1x8x128xf32, #tpu.memory_space<vmem>>, vector<1x8x128xf32>
      %17 = vector.shape_cast %16 : vector<1x8x128xf32> to vector<8x128xf32>
      %18 = vector.shape_cast %15 : vector<8x128xf32> to vector<1x8x128xf32>
      tpu.vector_store %arg4[%c0_12, %c0_13, %c0_14], %18 {strides = array<i32>} : memref<1x8x128xf32, #tpu.memory_space<vmem>>, vector<1x8x128xf32>,
    } else {
    }
    return
  }
  func.func @transform_0(%arg0: i32, %arg1: i32) -> (i32, i32) {
    %c1_i32 = arith.constant 1 : i32
    %0 = arith.muli %arg0, %c1_i32 : i32
    %1 = arith.addi %0, %arg1 : i32
    %c0_i32 = arith.constant 0 : i32
    %c0_i32_0 = arith.constant 0 : i32
    return %1, %c0_i32 : i32, i32
  }
  func.func @transform_1(%arg0: i32, %arg1: i32) -> (i32, i32) {
    %c1_i32 = arith.constant 1 : i32
    %0 = arith.muli %arg0, %c1_i32 : i32
    %1 = arith.addi %0, %arg1 : i32
    %c0_i32 = arith.constant 0 : i32
    %c0_i32_0 = arith.constant 0 : i32
    return %1, %c0_i32 : i32, i32
  }
  func.func @transform_2(%arg0: i32, %arg1: i32) -> (i32, i32, i32) {
    %c0_i32 = arith.constant 0 : i32
    %c0_i32_0 = arith.constant 0 : i32
    %c0_i32_1 = arith.constant 0 : i32
    return %arg0, %c0_i32, %c0_i32_0 : i32, i32, i32
  }
}

</mosaic_0001>

<bundles_post_ra>
// kernel: tpu_custom_call.1
= control target key start
LH: loop header
LB: loop body
LE: loop exit
PB: predicated region body
PF: predicated region fallthrough
CT: control target
= control target key end

     0   :  { %7 = vsyncpa [#allocation4], 0  ;;  %s223_s0 = inlined_call_operand.hbm [shape: f32[16,128], index: 0, kind: input, shape index: {}]   ;;  %s224_s1 = inlined_call_operand.hbm [shape: f32[16,128], index: 1, kind: input, shape index: {}]   ;;  %s225_s2 = inlined_call_operand.hbm [shape: f32[1,8,128], index: 2, kind: output, shape index: {}]  }
   0x1   :  { %8 = vsyncpa [#allocation7], 0 }
   0x2   :  { %9 = vsyncpa [#allocation5], 0  ;;  %s167_s9 = smov [#allocation3]   ;;  %s95_s13 = scalar_lea.hbm %s223_s0, 256 }
   0x3   :  { %s19_s10 = sshll.u32 %s167_s9, 4  ;;  %p96_p0 = scmp.ne.s32.totalorder %s223_s0, %s95_s13  ;;  %s20_s10 = int_to_ptr.vmem [resolvable:$true] %s19_s10 }
   0x4   :  { %p99_p1 = scmp.lt.u32.totalorder %s95_s13, %s223_s0 }
   0x6   :  { %p101_p2 = pnand %p99_p1, %p96_p0 }
   0x8   :  { %104 = shalt.err (!%p101_p2)
}
   0x9   :  { %s105_s18 = scalar_lea.vmem %s20_s10, 256  ;;  %p110_p4 = scmp.lt.s32.totalorder %s20_s10, %s20_s10 }
   0xa   :  { %p106_p3 = scmp.ne.s32.totalorder %s20_s10, %s105_s18  ;;  %p111_p5 = scmp.lt.s32.totalorder %s105_s18, %s105_s18 }
   0xc   :  { %p112_p6 = por %p111_p5, %p110_p4 }
   0xe   :  { %p113_p7 = pnand %p112_p6, %p106_p3 }
  0x10   :  { %116 = shalt.err (!%p113_p7)
}
  0x11   :  { %s168_s19 = smov 128   ;;  %s169_s20 = smov 8  }
  0x12   :  { %25 = dma.hbm_to_vmem [thread:$0]  %s223_s0, 256, %s20_s10, [#allocation4], %s168_s19, %s168_s19, %s169_s20  }
  0x13   :  { %s170_s23 = smov [#allocation6]   ;;  %s117_s27 = scalar_lea.hbm %s224_s1, 256 }
  0x14   :  { %s35_s24 = sshll.u32 %s170_s23, 4  ;;  %p118_p8 = scmp.ne.s32.totalorder %s224_s1, %s117_s27  ;;  %s36_s24 = int_to_ptr.vmem [resolvable:$true] %s35_s24 }
  0x15   :  { %p121_p9 = scmp.lt.u32.totalorder %s117_s27, %s224_s1 }
  0x17   :  { %p123_p10 = pnand %p121_p9, %p118_p8 }
  0x19   :  { %126 = shalt.err (!%p123_p10)
}
  0x1a   :  { %s127_s4 = scalar_lea.vmem %s36_s24, 256  ;;  %p132_p12 = scmp.lt.s32.totalorder %s36_s24, %s36_s24 }
  0x1b   :  { %p128_p11 = scmp.ne.s32.totalorder %s36_s24, %s127_s4  ;;  %p133_p13 = scmp.lt.s32.totalorder %s127_s4, %s127_s4 }
  0x1d   :  { %p134_p0 = por %p133_p13, %p132_p12 }
  0x1f   :  { %p135_p1 = pnand %p134_p0, %p128_p11 }
  0x21   :  { %138 = shalt.err (!%p135_p1)
}
  0x22   :  { %41 = dma.hbm_to_vmem [thread:$0]  %s224_s1, 256, %s36_s24, [#allocation7], %s168_s19, %s168_s19, %s169_s20  }
  0x23   :  { %161 = dma.done.wait [#allocation4], 256  }
  0x24   :  { %162 = vsyncadd [#allocation4], 4294967040 }
  0x25   :  { %163 = dma.done.wait [#allocation7], 256  }
  0x26   :  { %164 = vsyncadd [#allocation7], 4294967040  ;;  %v57_v0 = vld [vmem:[#allocation3] sm:$0xff]  ;;  %v58_v1 = vld [vmem:[#allocation3 + $0x8] sm:$0xff]  ;;  %s171_s6 = smov [#allocation8]  }
  0x27   :  { %v59_v2 = vld [vmem:[#allocation6] sm:$0xff]  ;;  %v60_v3 = vld [vmem:[#allocation6 + $0x8] sm:$0xff]  ;;  %s80_s7 = sshll.u32 %s171_s6, 4  ;;  %s81_s7 = int_to_ptr.vmem [resolvable:$true] %s80_s7 }
  0x28   :  { %v61_v4 = vsub.f32 %v57_v0, %v59_v2  ;;  %v62_v5 = vsub.f32 %v58_v1, %v60_v3  ;;  %s139_s8 = scalar_lea.vmem %s81_s7, 128  ;;  %p144_p3 = scmp.lt.s32.totalorder %s81_s7, %s81_s7 }
  0x29   :  { %p140_p2 = scmp.ne.s32.totalorder %s81_s7, %s139_s8  ;;  %p145_p4 = scmp.lt.s32.totalorder %s139_s8, %s139_s8 }
  0x2a   :  { %v63_v6 = vmul.f32 %v61_v4, %v61_v4  ;;  %v64_v7 = vmul.f32 %v62_v5, %v62_v5 }
  0x2b   :  { %p146_p5 = por %p145_p4, %p144_p3 }
  0x2c   :  { %v66_v8 = vadd.f32 %v64_v7, %v63_v6 }
  0x2d   :  { %p147_p6 = pnand %p146_p5, %p140_p2 }
  0x2e   :  { %73 = vst [vmem:[#allocation8] sm:$0xff] %v66_v8 }
  0x2f   :  { %150 = shalt.err (!%p147_p6)
}
  0x30   :  { %s151_s10 = scalar_lea.hbm %s225_s2, 128 }
  0x31   :  { %p152_p7 = scmp.ne.s32.totalorder %s225_s2, %s151_s10  ;;  %p155_p8 = scmp.lt.u32.totalorder %s151_s10, %s225_s2 }
  0x33   :  { %p157_p9 = pnand %p155_p8, %p152_p7 }
  0x35   :  { %160 = shalt.err (!%p157_p9)
}
  0x36   :  { %83 = dma.vmem_to_hbm [thread:$0]  %s81_s7, 128, %s225_s2, [#allocation5]  }
  0x37   :  { %165 = dma.done.wait [#allocation5], 128  }
  0x38   :  { %166 = vsyncadd [#allocation5], 4294967168 }
  0x39   :  { %87 = vsyncpa [#allocation4], 1 }
  0x3a   :  { %88 = vsyncpa [#allocation7], 1 }
  0x3b   :  { %89 = vsyncpa [#allocation5], 1 }

</bundles_post_ra>
